<compile_context>
chip_gen: v7x
topology: tpu7x:2x2x1
jax: 0.10.0
libtpu: 0.0.40
codegen_flags: <defaults>
</compile_context>

<pallas_src>
import functools

import jax
import jax.numpy as jnp
from jax.experimental import pallas as pl
from jax.experimental.pallas import tpu as pltpu

LANE = 128
SUB = 8 * LANE            # minimum aligned chunk: one (8,128) f32 tile
MAX_BLOCK_ROWS = 4096     # (4096,128) f32 block = 2 MiB per input buffer
SLAB_ROWS = 8             # each partial-sum slab is a full (8,128) vreg tile


def _dice_bce_partial_kernel(x_ref, t_ref, out_ref, *,
                             total_rows, block_rows, ragged):
    i = pl.program_id(0)

    # Output block is resident across the (single) reduction axis -> accumulator.
    @pl.when(i == 0)
    def _():
        out_ref[...] = jnp.zeros_like(out_ref)

    x = x_ref[...].astype(jnp.float32)
    t = t_ref[...].astype(jnp.float32)

    # sigmoid / BCE via softplus identities:
    #   -log(sigmoid(x))     = softplus(-x)
    #   -log(1 - sigmoid(x)) = x + softplus(-x)
    # F.binary_cross_entropy clamps each log term at -100 (i.e. -log at 100).
    sp = jax.nn.softplus(-x)
    p = jnp.exp(-sp)                                        # sigmoid(x)
    bce = t * jnp.minimum(sp, 100.0) + (1.0 - t) * jnp.minimum(x + sp, 100.0)
    pt = p * t                                              # dice intersection
    ppt = p + t                                             # dice denominator

    groups = block_rows // SLAB_ROWS

    def accumulate(a, b, c):
        # (block_rows,128) -> (groups,8,128), reduce over the leading (vreg)
        # axis: pure VALU adds, full unmasked (8,128) stores.
        out_ref[0:8, :] += a.reshape(groups, SLAB_ROWS, LANE).sum(axis=0)
        out_ref[8:16, :] += b.reshape(groups, SLAB_ROWS, LANE).sum(axis=0)
        out_ref[16:24, :] += c.reshape(groups, SLAB_ROWS, LANE).sum(axis=0)

    if ragged:
        # Only the final block can contain out-of-range (undefined) rows;
        # every other step takes the unmasked path.
        last = pl.num_programs(0) - 1

        @pl.when(i != last)
        def _():
            accumulate(pt, ppt, bce)

        @pl.when(i == last)
        def _():
            row = jax.lax.broadcasted_iota(jnp.int32, (block_rows, LANE), 0)
            valid = (i * block_rows + row) < total_rows
            accumulate(jnp.where(valid, pt, 0.0),
                       jnp.where(valid, ppt, 0.0),
                       jnp.where(valid, bce, 0.0))
    else:
        accumulate(pt, ppt, bce)


def _partial_sums_jnp(x, t):
    # Tiny epilogue for the <1024-element ragged tail (avoids jnp.pad copies).
    x = x.astype(jnp.float32)
    t = t.astype(jnp.float32)
    sp = jax.nn.softplus(-x)
    p = jnp.exp(-sp)
    bce = t * jnp.minimum(sp, 100.0) + (1.0 - t) * jnp.minimum(x + sp, 100.0)
    return jnp.sum(p * t), jnp.sum(p + t), jnp.sum(bce)


def dice_bce_loss(inputs, targets, smooth=1.0):
    n = int(inputs.size)
    x = inputs.reshape(-1)
    t = targets.reshape(-1)

    # Aligned prefix: largest multiple of 8*128 elements -> free (rows,128)
    # reshape view, streamed by the kernel.  Remainder handled in jnp below.
    n_main = (n // SUB) * SUB

    inter = jnp.float32(0.0)
    denom = jnp.float32(0.0)
    bce_sum = jnp.float32(0.0)

    if n_main:
        rows = n_main // LANE                    # multiple of 8
        xm = x[:n_main].reshape(rows, LANE)
        tm = t[:n_main].reshape(rows, LANE)

        block_rows = min(MAX_BLOCK_ROWS, rows)   # multiple of 8
        steps = pl.cdiv(rows, block_rows)
        ragged = (rows % block_rows) != 0        # only then does the last
                                                 # block need a mask

        kernel = functools.partial(
            _dice_bce_partial_kernel,
            total_rows=int(rows), block_rows=int(block_rows),
            ragged=bool(ragged))

        tile_spec = pl.BlockSpec((block_rows, LANE), lambda i: (i, 0))

        partials = pl.pallas_call(
            kernel,
            out_shape=jax.ShapeDtypeStruct((3 * SLAB_ROWS, LANE), jnp.float32),
            grid_spec=pltpu.PrefetchScalarGridSpec(
                num_scalar_prefetch=0,
                grid=(steps,),
                in_specs=[tile_spec, tile_spec],
                out_specs=pl.BlockSpec((3 * SLAB_ROWS, LANE),
                                       lambda i: (0, 0)),
            ),
            compiler_params=pltpu.CompilerParams(
                dimension_semantics=("arbitrary",)),
        )(xm, tm)

        o = partials.reshape(3, SLAB_ROWS, LANE)
        inter = jnp.sum(o[0])                    # sum(p * t)
        denom = jnp.sum(o[1])                    # sum(p) + sum(t)
        bce_sum = jnp.sum(o[2])                  # sum of BCE terms

    if n_main < n:                               # ragged tail (< 1024 elems)
        ti, td, tb = _partial_sums_jnp(x[n_main:], t[n_main:])
        inter = inter + ti
        denom = denom + td
        bce_sum = bce_sum + tb

    smooth = jnp.float32(smooth)
    dice_loss = 1.0 - (2.0 * inter + smooth) / (denom + smooth)
    bce = bce_sum / jnp.float32(n)
    return bce + dice_loss


def _reference(inputs, targets, smooth=1.0):
    # PyTorch-faithful: sigmoid -> Dice + F.binary_cross_entropy (mean, -100 clamp).
    p = jax.nn.sigmoid(inputs.reshape(-1).astype(jnp.float32))
    t = targets.reshape(-1).astype(jnp.float32)
    inter = jnp.sum(p * t)
    dice = 1.0 - (2.0 * inter + smooth) / (jnp.sum(p) + jnp.sum(t) + smooth)
    log_p = jnp.maximum(jnp.log(p), -100.0)
    log_1mp = jnp.maximum(jnp.log1p(-p), -100.0)
    bce = jnp.mean(-(t * log_p + (1.0 - t) * log_1mp))
    return bce + dice


if __name__ == "__main__":
    key = jax.random.PRNGKey(0)
    k1, k2 = jax.random.split(key)
    # Module is a pure loss: "inputs" are logits, "targets" are binary masks.
    inputs = jax.random.normal(k1, (2, 4, 16, 16), dtype=jnp.float32)
    targets = jax.random.bernoulli(k2, 0.5, (2, 4, 16, 16)).astype(jnp.float32)

    loss = dice_bce_loss(inputs, targets, smooth=1.0)
    jax.block_until_ready(loss)

    ref = _reference(inputs, targets, smooth=1.0)
    assert jnp.allclose(loss, ref, rtol=1e-5, atol=1e-5), (loss, ref)

    print("KERNEL_OK")
</pallas_src>

<mosaic_0001>
module attributes {stable_mosaic.version = 11 : i64} {
  func.func @_dice_bce_partial_kernel(%arg0: i32, %arg1: memref<16x128xf32, #tpu.memory_space<vmem>>, %arg2: memref<16x128xf32, #tpu.memory_space<vmem>>, %arg3: memref<24x128xf32, #tpu.memory_space<vmem>>) attributes {dimension_semantics = [#tpu.dimension_semantics<arbitrary>], iteration_bounds = array<i64: 1>, scalar_prefetch = 0 : i64, scratch_operands = 0 : i64, tpu.core_type = #tpu.core_type<tc>, window_params = [{transform_indices = @transform_0, window_bounds = array<i64: 16, 128>}, {transform_indices = @transform_1, window_bounds = array<i64: 16, 128>}, {pipeline_mode = #tpu.pipeline_mode<synchronous>, transform_indices = @transform_2, window_bounds = array<i64: 24, 128>}]} {
    %c0_i32 = arith.constant 0 : i32
    %0 = arith.cmpi eq, %arg0, %c0_i32 : i32
    %1 = arith.extui %0 : i1 to i32
    %c0_i32_0 = arith.constant 0 : i32
    %2 = arith.cmpi ne, %1, %c0_i32_0 : i32
    scf.if %2 {
      %cst_23 = arith.constant 0.000000e+00 : f32
      %51 = vector.broadcast %cst_23 : f32 to vector<24x128xf32>
      %c0_24 = arith.constant 0 : index
      %c0_25 = arith.constant 0 : index
      %52 = vector.load %arg3[%c0_24, %c0_25] : memref<24x128xf32, #tpu.memory_space<vmem>>, vector<24x128xf32>
      tpu.vector_store %arg3[%c0_24, %c0_25], %51 {strides = array<i32>} : memref<24x128xf32, #tpu.memory_space<vmem>>, vector<24x128xf32>,
    } else {
    }
    %c0 = arith.constant 0 : index
    %c0_1 = arith.constant 0 : index
    %3 = vector.load %arg1[%c0, %c0_1] : memref<16x128xf32, #tpu.memory_space<vmem>>, vector<16x128xf32>
    %c0_2 = arith.constant 0 : index
    %c0_3 = arith.constant 0 : index
    %4 = vector.load %arg2[%c0_2, %c0_3] : memref<16x128xf32, #tpu.memory_space<vmem>>, vector<16x128xf32>
    %cst = arith.constant 0.000000e+00 : f32
    %5 = vector.broadcast %cst : f32 to vector<16x128xf32>
    %6 = arith.subf %5, %3 : vector<16x128xf32>
    %cst_4 = arith.constant 0.000000e+00 : f32
    %7 = vector.broadcast %cst_4 : f32 to vector<16x128xf32>
    %8 = arith.maximumf %6, %7 : vector<16x128xf32>
    %9 = vector.broadcast %cst_4 : f32 to vector<16x128xf32>
    %10 = arith.subf %6, %9 : vector<16x128xf32>
    %11 = arith.cmpf one, %10, %10 : vector<16x128xf32>
    %12 = vector.broadcast %cst_4 : f32 to vector<16x128xf32>
    %13 = arith.addf %6, %12 : vector<16x128xf32>
    %14 = math.absf %10 : vector<16x128xf32>
    %cst_5 = arith.constant 0.000000e+00 : f32
    %15 = vector.broadcast %cst_5 : f32 to vector<16x128xf32>
    %16 = arith.subf %15, %14 : vector<16x128xf32>
    %17 = math.exp %16 : vector<16x128xf32>
    %18 = math.log1p %17 : vector<16x128xf32>
    %19 = arith.addf %8, %18 : vector<16x128xf32>
    %20 = arith.select %11, %13, %19 : vector<16x128xi1>, vector<16x128xf32>
    %cst_6 = arith.constant 0.000000e+00 : f32
    %21 = vector.broadcast %cst_6 : f32 to vector<16x128xf32>
    %22 = arith.subf %21, %20 : vector<16x128xf32>
    %23 = math.exp %22 : vector<16x128xf32>
    %cst_7 = arith.constant 1.000000e+02 : f32
    %24 = vector.broadcast %cst_7 : f32 to vector<16x128xf32>
    %25 = arith.minimumf %20, %24 : vector<16x128xf32>
    %26 = arith.mulf %4, %25 : vector<16x128xf32>
    %cst_8 = arith.constant 1.000000e+00 : f32
    %27 = vector.broadcast %cst_8 : f32 to vector<16x128xf32>
    %28 = arith.subf %27, %4 : vector<16x128xf32>
    %29 = arith.addf %3, %20 : vector<16x128xf32>
    %cst_9 = arith.constant 1.000000e+02 : f32
    %30 = vector.broadcast %cst_9 : f32 to vector<16x128xf32>
    %31 = arith.minimumf %29, %30 : vector<16x128xf32>
    %32 = arith.mulf %28, %31 : vector<16x128xf32>
    %33 = arith.addf %26, %32 : vector<16x128xf32>
    %34 = arith.mulf %23, %4 : vector<16x128xf32>
    %35 = arith.addf %23, %4 : vector<16x128xf32>
    %c0_10 = arith.constant 0 : index
    %c0_11 = arith.constant 0 : index
    %36 = vector.load %arg3[%c0_10, %c0_11] : memref<24x128xf32, #tpu.memory_space<vmem>>, vector<8x128xf32>
    %37 = vector.shape_cast %34 : vector<16x128xf32> to vector<2x8x128xf32>
    %cst_12 = arith.constant dense<0.000000e+00> : vector<8x128xf32>
    %38 = vector.multi_reduction <add>, %37, %cst_12 [0] : vector<2x8x128xf32> to vector<8x128xf32>
    %39 = arith.addf %36, %38 : vector<8x128xf32>
    %c0_13 = arith.constant 0 : index
    %c0_14 = arith.constant 0 : index
    %40 = vector.load %arg3[%c0_13, %c0_14] : memref<24x128xf32, #tpu.memory_space<vmem>>, vector<8x128xf32>
    tpu.vector_store %arg3[%c0_13, %c0_14], %39 {strides = array<i32>} : memref<24x128xf32, #tpu.memory_space<vmem>>, vector<8x128xf32>,
    %c8 = arith.constant 8 : index
    %c0_15 = arith.constant 0 : index
    %41 = vector.load %arg3[%c8, %c0_15] : memref<24x128xf32, #tpu.memory_space<vmem>>, vector<8x128xf32>
    %42 = vector.shape_cast %35 : vector<16x128xf32> to vector<2x8x128xf32>
    %cst_16 = arith.constant dense<0.000000e+00> : vector<8x128xf32>
    %43 = vector.multi_reduction <add>, %42, %cst_16 [0] : vector<2x8x128xf32> to vector<8x128xf32>
    %44 = arith.addf %41, %43 : vector<8x128xf32>
    %c8_17 = arith.constant 8 : index
    %c0_18 = arith.constant 0 : index
    %45 = vector.load %arg3[%c8_17, %c0_18] : memref<24x128xf32, #tpu.memory_space<vmem>>, vector<8x128xf32>
    tpu.vector_store %arg3[%c8_17, %c0_18], %44 {strides = array<i32>} : memref<24x128xf32, #tpu.memory_space<vmem>>, vector<8x128xf32>,
    %c16 = arith.constant 16 : index
    %c0_19 = arith.constant 0 : index
    %46 = vector.load %arg3[%c16, %c0_19] : memref<24x128xf32, #tpu.memory_space<vmem>>, vector<8x128xf32>
    %47 = vector.shape_cast %33 : vector<16x128xf32> to vector<2x8x128xf32>
    %cst_20 = arith.constant dense<0.000000e+00> : vector<8x128xf32>
    %48 = vector.multi_reduction <add>, %47, %cst_20 [0] : vector<2x8x128xf32> to vector<8x128xf32>
    %49 = arith.addf %46, %48 : vector<8x128xf32>
    %c16_21 = arith.constant 16 : index
    %c0_22 = arith.constant 0 : index
    %50 = vector.load %arg3[%c16_21, %c0_22] : memref<24x128xf32, #tpu.memory_space<vmem>>, vector<8x128xf32>
    tpu.vector_store %arg3[%c16_21, %c0_22], %49 {strides = array<i32>} : memref<24x128xf32, #tpu.memory_space<vmem>>, vector<8x128xf32>,
    return
  }
  func.func @transform_0(%arg0: i32) -> (i32, i32) {
    %c0_i32 = arith.constant 0 : i32
    %c0_i32_0 = arith.constant 0 : i32
    return %arg0, %c0_i32 : i32, i32
  }
  func.func @transform_1(%arg0: i32) -> (i32, i32) {
    %c0_i32 = arith.constant 0 : i32
    %c0_i32_0 = arith.constant 0 : i32
    return %arg0, %c0_i32 : i32, i32
  }
  func.func @transform_2(%arg0: i32) -> (i32, i32) {
    %c0_i32 = arith.constant 0 : i32
    %c0_i32_0 = arith.constant 0 : i32
    %c0_i32_1 = arith.constant 0 : i32
    return %c0_i32, %c0_i32_0 : i32, i32
  }
}

</mosaic_0001>

<bundles_post_ra>
// kernel: tpu_custom_call.1
= control target key start
LH: loop header
LB: loop body
LE: loop exit
PB: predicated region body
PF: predicated region fallthrough
CT: control target
= control target key end

     0   :  { %7 = vsyncpa [#allocation3], 0  ;;  %s298_s0 = inlined_call_operand.hbm [shape: f32[16,128], index: 0, kind: input, shape index: {}]   ;;  %s299_s1 = inlined_call_operand.hbm [shape: f32[16,128], index: 1, kind: input, shape index: {}]   ;;  %s300_s2 = inlined_call_operand.hbm [shape: f32[24,128], index: 2, kind: output, shape index: {}]  }
   0x1   :  { %8 = vsyncpa [#allocation6], 0 }
   0x2   :  { %9 = vsyncpa [#allocation4], 0  ;;  %s233_s9 = smov [#allocation2]   ;;  %s161_s13 = scalar_lea.hbm %s298_s0, 256 }
   0x3   :  { %s15_s10 = sshll.u32 %s233_s9, 4  ;;  %p162_p0 = scmp.ne.s32.totalorder %s298_s0, %s161_s13  ;;  %s16_s10 = int_to_ptr.vmem [resolvable:$true] %s15_s10 }
   0x4   :  { %p165_p1 = scmp.lt.u32.totalorder %s161_s13, %s298_s0 }
   0x6   :  { %p167_p2 = pnand %p165_p1, %p162_p0 }
   0x8   :  { %170 = shalt.err (!%p167_p2)
}
   0x9   :  { %s171_s18 = scalar_lea.vmem %s16_s10, 256  ;;  %p176_p4 = scmp.lt.s32.totalorder %s16_s10, %s16_s10 }
   0xa   :  { %p172_p3 = scmp.ne.s32.totalorder %s16_s10, %s171_s18  ;;  %p177_p5 = scmp.lt.s32.totalorder %s171_s18, %s171_s18 }
   0xc   :  { %p178_p6 = por %p177_p5, %p176_p4 }
   0xe   :  { %p179_p7 = pnand %p178_p6, %p172_p3 }
  0x10   :  { %182 = shalt.err (!%p179_p7)
}
  0x11   :  { %s234_s19 = smov 128   ;;  %s235_s20 = smov 8  }
  0x12   :  { %21 = dma.hbm_to_vmem [thread:$0]  %s298_s0, 256, %s16_s10, [#allocation3], %s234_s19, %s234_s19, %s235_s20  }
  0x13   :  { %s236_s23 = smov [#allocation5]   ;;  %s183_s27 = scalar_lea.hbm %s299_s1, 256 }
  0x14   :  { %s27_s24 = sshll.u32 %s236_s23, 4  ;;  %p184_p8 = scmp.ne.s32.totalorder %s299_s1, %s183_s27  ;;  %s28_s24 = int_to_ptr.vmem [resolvable:$true] %s27_s24 }
  0x15   :  { %p187_p9 = scmp.lt.u32.totalorder %s183_s27, %s299_s1 }
  0x17   :  { %p189_p10 = pnand %p187_p9, %p184_p8 }
  0x19   :  { %192 = shalt.err (!%p189_p10)
}
  0x1a   :  { %s193_s4 = scalar_lea.vmem %s28_s24, 256  ;;  %p198_p12 = scmp.lt.s32.totalorder %s28_s24, %s28_s24 }
  0x1b   :  { %p194_p11 = scmp.ne.s32.totalorder %s28_s24, %s193_s4  ;;  %p199_p13 = scmp.lt.s32.totalorder %s193_s4, %s193_s4 }
  0x1d   :  { %p200_p0 = por %p199_p13, %p198_p12 }
  0x1f   :  { %p201_p1 = pnand %p200_p0, %p194_p11 }
  0x21   :  { %204 = shalt.err (!%p201_p1)
}
  0x22   :  { %33 = dma.hbm_to_vmem [thread:$0]  %s299_s1, 256, %s28_s24, [#allocation6], %s234_s19, %s234_s19, %s235_s20  }
  0x23   :  { %227 = dma.done.wait [#allocation3], 256  }
  0x24   :  { %228 = vsyncadd [#allocation3], 4294967040 }
  0x25   :  { %229 = dma.done.wait [#allocation6], 256  }
  0x26   :  { %230 = vsyncadd [#allocation6], 4294967040  ;;  %v47_v0 = vld [vmem:[#allocation2] sm:$0xff]  ;;  %v48_v1 = vld [vmem:[#allocation2 + $0x8] sm:$0xff]  ;;  %s237_s1 = smov [#allocation7]  }
  0x27   :  { %v51_v2 = vsub.f32 0.0, %v47_v0  ;;  %v52_v3 = vsub.f32 0.0, %v48_v1  ;;  %v49_v28 = vld [vmem:[#allocation5] sm:$0xff]  ;;  %v50_v32 = vld [vmem:[#allocation5 + $0x8] sm:$0xff]  ;;  %s130_s6 = sshll.u32 %s237_s1, 4  ;;  %s131_s6 = int_to_ptr.vmem [resolvable:$true] %s130_s6 }
  0x28   :  { %v99_v35 = vsub.f32 1.0, %v49_v28  ;;  %v100_v42 = vsub.f32 1.0, %v50_v32  ;;  %s205_s7 = scalar_lea.vmem %s131_s6, 384  ;;  %p210_p3 = scmp.lt.s32.totalorder %s131_s6, %s131_s6 }
  0x29   :  { %v59_v4 = vand.u32 2147483647, %v51_v2  ;;  %v60_v5 = vand.u32 2147483647, %v52_v3  ;;  %v53_v22 = vmax.f32 %v51_v2, 0.0  ;;  %v54_v25 = vmax.f32 %v52_v3, 0.0  ;;  %p206_p2 = scmp.ne.s32.totalorder %s131_s6, %s205_s7  ;;  %p211_p4 = scmp.lt.s32.totalorder %s205_s7, %s205_s7 }
  0x2a   :  { %vm55_vm2 = vcmp.ne.f32.partialorder %v51_v2, %v51_v2  ;;  %vm56_vm3 = vcmp.ne.f32.partialorder %v52_v3, %v52_v3 }
  0x2b   :  { %v61_v6 = vsub.f32 0.0, %v59_v4  ;;  %v62_v7 = vsub.f32 0.0, %v60_v5  ;;  %p212_p5 = por %p211_p4, %p210_p3 }
  0x2d   :  { %v63_v8 = vmul.f32 1.442695, %v61_v6  ;;  %v65_v9 = vmul.f32 1.442695, %v62_v7  ;;  %p213_p6 = pnand %p212_p5, %p206_p2 }
  0x2f   :  { %149 = vpow2.f32 %v63_v8 }
  0x30   :  { %151 = vpow2.f32 %v65_v9 }
  0x39   :  { %v150_v10 = vpop.eup %149 }
  0x3a   :  { %v152_v11 = vpop.eup %151  ;;  %v67_v12 = vadd.f32 1.0, %v150_v10  ;;  %v70_v14 = vmul.f32 -0.5, %v150_v10  ;;  %v73_v17 = vand.u32 2147483647, %v150_v10 }
  0x3b   :  { %v76_v13 = vadd.f32 1.0, %v152_v11  ;;  %v79_v15 = vmul.f32 -0.5, %v152_v11  ;;  %v82_v19 = vand.u32 2147483647, %v152_v11 }
  0x3c   :  { %153 = vlog2.f32 %v67_v12  ;;  %v71_v16 = vadd.f32 1.0, %v70_v14  ;;  %vm74_vm0 = vcmp.lt.f32.partialorder %v73_v17, 0.0004427343 }
  0x3d   :  { %155 = vlog2.f32 %v76_v13  ;;  %v80_v18 = vadd.f32 1.0, %v79_v15  ;;  %vm83_vm1 = vcmp.lt.f32.partialorder %v82_v19, 0.0004427343 }
  0x3e   :  { %v72_v20 = vmul.f32 %v150_v10, %v71_v16 }
  0x3f   :  { %v81_v23 = vmul.f32 %v152_v11, %v80_v18 }
  0x46   :  { %v154_v21 = vpop.eup %153 }
  0x47   :  { %v156_v24 = vpop.eup %155  ;;  %v69_v26 = vmul.f32 0.6931472, %v154_v21 }
  0x48   :  { %v78_v27 = vmul.f32 0.6931472, %v156_v24 }
  0x49   :  { %v75_v29 = vsel %vm74_vm0, %v72_v20, %v69_v26 }
  0x4a   :  { %v84_v30 = vsel %vm83_vm1, %v81_v23, %v78_v27  ;;  %v85_v31 = vadd.f32 %v75_v29, %v53_v22 }
  0x4b   :  { %v86_v33 = vadd.f32 %v84_v30, %v54_v25 }
  0x4c   :  { %v87_v34 = vsel %vm55_vm2, %v51_v2, %v85_v31 }
  0x4d   :  { %v88_v36 = vsel %vm56_vm3, %v52_v3, %v86_v33  ;;  %v89_v37 = vsub.f32 0.0, %v87_v34  ;;  %v95_v38 = vmin.f32 %v87_v34, 100.0  ;;  %v101_v39 = vadd.f32 %v87_v34, %v47_v0 }
  0x4e   :  { %v90_v40 = vsub.f32 0.0, %v88_v36  ;;  %v96_v41 = vmin.f32 %v88_v36, 100.0  ;;  %v102_v43 = vadd.f32 %v88_v36, %v48_v1 }
  0x4f   :  { %v91_v44 = vmul.f32 1.442695, %v89_v37  ;;  %v97_v45 = vmul.f32 %v95_v38, %v49_v28  ;;  %v103_v46 = vmin.f32 %v101_v39, 100.0 }
  0x50   :  { %v93_v47 = vmul.f32 1.442695, %v90_v40  ;;  %v98_v48 = vmul.f32 %v96_v41, %v50_v32  ;;  %v104_v49 = vmin.f32 %v102_v43, 100.0 }
  0x51   :  { %157 = vpow2.f32 %v91_v44  ;;  %v105_v50 = vmul.f32 %v103_v46, %v99_v35 }
  0x52   :  { %159 = vpow2.f32 %v93_v47  ;;  %v106_v51 = vmul.f32 %v104_v49, %v100_v42 }
  0x53   :  { %v107_v52 = vadd.f32 %v105_v50, %v97_v45 }
  0x54   :  { %v108_v53 = vadd.f32 %v106_v51, %v98_v48 }
  0x56   :  { %v122_v54 = vadd.f32 %v108_v53, %v107_v52 }
  0x58   :  { %124 = vst [vmem:[#allocation7 + $0x10] sm:$0xff] %v122_v54 }
  0x5b   :  { %v158_v55 = vpop.eup %157 }
  0x5c   :  { %v160_v56 = vpop.eup %159  ;;  %v109_v57 = vmul.f32 %v158_v55, %v49_v28  ;;  %v111_v58 = vadd.f32 %v158_v55, %v49_v28 }
  0x5d   :  { %v110_v59 = vmul.f32 %v160_v56, %v50_v32  ;;  %v112_v60 = vadd.f32 %v160_v56, %v50_v32 }
  0x5f   :  { %v114_v61 = vadd.f32 %v110_v59, %v109_v57  ;;  %v118_v62 = vadd.f32 %v112_v60, %v111_v58 }
  0x61   :  { %116 = vst [vmem:[#allocation7] sm:$0xff] %v114_v61  ;;  %120 = vst [vmem:[#allocation7 + $0x8] sm:$0xff] %v118_v62 }
  0x62   :  { %216 = shalt.err (!%p213_p6)
}
  0x63   :  { %s217_s10 = scalar_lea.hbm %s300_s2, 384 }
  0x64   :  { %p218_p7 = scmp.ne.s32.totalorder %s300_s2, %s217_s10  ;;  %p221_p8 = scmp.lt.u32.totalorder %s217_s10, %s300_s2 }
  0x66   :  { %p223_p9 = pnand %p221_p8, %p218_p7 }
  0x68   :  { %226 = shalt.err (!%p223_p9)
}
  0x69   :  { %136 = dma.vmem_to_hbm [thread:$0]  %s131_s6, 384, %s300_s2, [#allocation4], %s234_s19, %s234_s19, %s235_s20  }
  0x6a   :  { %231 = dma.done.wait [#allocation4], 384  }
  0x6b   :  { %232 = vsyncadd [#allocation4], 4294966912 }
  0x6c   :  { %140 = vsyncpa [#allocation3], 1 }
  0x6d   :  { %141 = vsyncpa [#allocation6], 1 }
  0x6e   :  { %142 = vsyncpa [#allocation4], 1 }

</bundles_post_ra>
